<compile_context>
chip_gen: v5e
topology: v5e:2x2
jax: 0.10.0
libtpu: 0.0.40
codegen_flags: <defaults>
</compile_context>

<pallas_src>
import jax
import jax.numpy as jnp
from jax.experimental import pallas as pl
from jax.experimental.pallas import tpu as pltpu

_LANE = 128
_MAX_TILE_ROWS = 512  # 512 x 128 x 4 B = 256 KiB per f32 VMEM buffer


# ----------------------------- kernels ------------------------------------ #

def _uniform_from_bits(bits, shape):
    """uint32 random bits -> uniform f32 in [0, 1) (23 mantissa bits)."""
    ubits = pltpu.bitcast(bits, jnp.uint32)
    mant = jax.lax.shift_right_logical(ubits, jnp.uint32(9))
    fbits = jnp.bitwise_or(mant, jnp.uint32(0x3F800000))  # exponent for [1, 2)
    return pltpu.bitcast(fbits, jnp.float32) - 1.0


def _bernoulli_prng_kernel(seed_ref, x_ref, o_ref):
    # Per-tile seed -> independent streams per grid step / TensorCore.
    pltpu.prng_seed(seed_ref[0], pl.program_id(0))
    u = _uniform_from_bits(pltpu.prng_random_bits(x_ref.shape), x_ref.shape)
    x = x_ref[...].astype(jnp.float32)          # in-kernel upcast
    o_ref[...] = jnp.ceil(x - u).astype(o_ref.dtype)  # in-kernel downcast


def _bernoulli_uniform_kernel(x_ref, u_ref, o_ref):
    # Portable fallback: uniforms are generated on the host and streamed in.
    x = x_ref[...].astype(jnp.float32)
    o_ref[...] = jnp.ceil(x - u_ref[...]).astype(o_ref.dtype)


# ----------------------------- wrapper ------------------------------------- #

def _pad_to_slab(x):
    """Flatten x into a lane-dense (rows, 128) slab, rows % tile_rows == 0."""
    total = x.size
    rows_needed = (total + _LANE - 1) // _LANE
    # Multiple of 32 keeps the sublane dim legal for f32/bf16/int8 packing.
    tile_rows = min(_MAX_TILE_ROWS, ((rows_needed + 31) // 32) * 32)
    rows = ((rows_needed + tile_rows - 1) // tile_rows) * tile_rows
    pad = rows * _LANE - total
    x_flat = jnp.ravel(x)                    # layout-preserving (free)
    if pad:
        x_flat = jnp.pad(x_flat, (0, pad))   # single fused pad, no concat chain
    return x_flat.reshape(rows, _LANE), rows, tile_rows


def _bernoulli_tpu(x2, rows, tile_rows, seed, out_dtype):
    seed_arr = jnp.asarray([seed], dtype=jnp.int32)
    return pl.pallas_call(
        _bernoulli_prng_kernel,
        out_shape=jax.ShapeDtypeStruct((rows, _LANE), out_dtype),
        grid_spec=pltpu.PrefetchScalarGridSpec(
            num_scalar_prefetch=1,
            grid=(rows // tile_rows,),
            in_specs=[pl.BlockSpec((tile_rows, _LANE),
                                   lambda i, seed_ref: (i, 0))],
            out_specs=pl.BlockSpec((tile_rows, _LANE),
                                   lambda i, seed_ref: (i, 0)),
        ),
        compiler_params=pltpu.CompilerParams(
            dimension_semantics=("parallel",),   # shard tiles across v7x TCs
        ),
    )(seed_arr, x2)


def _bernoulli_fallback(x2, rows, tile_rows, seed, out_dtype):
    u2 = jax.random.uniform(jax.random.PRNGKey(seed), (rows, _LANE),
                            dtype=jnp.float32)
    return pl.pallas_call(
        _bernoulli_uniform_kernel,
        out_shape=jax.ShapeDtypeStruct((rows, _LANE), out_dtype),
        grid=(rows // tile_rows,),
        in_specs=[pl.BlockSpec((tile_rows, _LANE), lambda i: (i, 0)),
                  pl.BlockSpec((tile_rows, _LANE), lambda i: (i, 0))],
        out_specs=pl.BlockSpec((tile_rows, _LANE), lambda i: (i, 0)),
        compiler_params=pltpu.CompilerParams(
            dimension_semantics=("parallel",),
        ),
    )(x2, u2)


def bernoulli_sample(x, seed=0):
    """Pallas equivalent of Bernoulli_sample.forward(x)."""
    orig_shape, orig_dtype = x.shape, x.dtype
    total = x.size
    x2, rows, tile_rows = _pad_to_slab(x)

    if jax.default_backend() == "tpu":
        try:
            out2 = _bernoulli_tpu(x2, rows, tile_rows, seed, orig_dtype)
        except Exception:
            # e.g. forced interpret mode where pltpu.prng_* cannot lower.
            out2 = _bernoulli_fallback(x2, rows, tile_rows, seed, orig_dtype)
    else:
        out2 = _bernoulli_fallback(x2, rows, tile_rows, seed, orig_dtype)

    return out2.reshape(-1)[:total].reshape(orig_shape)


# TODO(synk): the PyTorch module's custom straight-through backward (Ceil/Sub
# autograd Functions) is not implemented here; forward pass only.

if __name__ == "__main__":
    key = jax.random.PRNGKey(0)
    # Probabilities in [0, 1], NCHW layout like the PyTorch module expects.
    x = jax.random.uniform(key, (2, 4, 16, 16), dtype=jnp.float32)

    out = bernoulli_sample(x, seed=0)
    out = jax.block_until_ready(out)

    assert out.shape == x.shape and out.dtype == x.dtype
    # For inputs in [0, 1], ceil(x - u) with u ~ U[0, 1) is always 0 or 1.
    assert bool(jnp.all((out == 0.0) | (out == 1.0)))

    # Endpoint checks (u in [0,1) like torch.rand): p=1 -> 1, p=0 -> 0.
    ones = jax.block_until_ready(
        bernoulli_sample(jnp.ones((8, 128), jnp.float32), seed=3))
    zeros = jax.block_until_ready(
        bernoulli_sample(jnp.zeros((8, 128), jnp.float32), seed=3))
    assert bool(jnp.all(ones == 1.0)) and bool(jnp.all(zeros == 0.0))

    print("KERNEL_OK")
</pallas_src>

<mosaic_0001>
module attributes {stable_mosaic.version = 11 : i64} {
  func.func @_bernoulli_uniform_kernel(%arg0: i32, %arg1: memref<32x128xf32, #tpu.memory_space<vmem>>, %arg2: memref<32x128xf32, #tpu.memory_space<vmem>>, %arg3: memref<32x128xf32, #tpu.memory_space<vmem>>) attributes {dimension_semantics = [#tpu.dimension_semantics<parallel>], iteration_bounds = array<i64: 1>, scalar_prefetch = 0 : i64, scratch_operands = 0 : i64, tpu.core_type = #tpu.core_type<tc>, window_params = [{transform_indices = @transform_0, window_bounds = array<i64: 32, 128>}, {transform_indices = @transform_1, window_bounds = array<i64: 32, 128>}, {transform_indices = @transform_2, window_bounds = array<i64: 32, 128>}]} {
    %c0 = arith.constant 0 : index
    %c0_0 = arith.constant 0 : index
    %0 = vector.load %arg1[%c0, %c0_0] : memref<32x128xf32, #tpu.memory_space<vmem>>, vector<32x128xf32>
    %c0_1 = arith.constant 0 : index
    %c0_2 = arith.constant 0 : index
    %1 = vector.load %arg2[%c0_1, %c0_2] : memref<32x128xf32, #tpu.memory_space<vmem>>, vector<32x128xf32>
    %2 = arith.subf %0, %1 : vector<32x128xf32>
    %3 = math.ceil %2 : vector<32x128xf32>
    %c0_3 = arith.constant 0 : index
    %c0_4 = arith.constant 0 : index
    %4 = vector.load %arg3[%c0_3, %c0_4] : memref<32x128xf32, #tpu.memory_space<vmem>>, vector<32x128xf32>
    tpu.vector_store %arg3[%c0_3, %c0_4], %3 {strides = array<i32>} : memref<32x128xf32, #tpu.memory_space<vmem>>, vector<32x128xf32>,
    return
  }
  func.func @transform_0(%arg0: i32) -> (i32, i32) {
    %c0_i32 = arith.constant 0 : i32
    %c0_i32_0 = arith.constant 0 : i32
    return %arg0, %c0_i32 : i32, i32
  }
  func.func @transform_1(%arg0: i32) -> (i32, i32) {
    %c0_i32 = arith.constant 0 : i32
    %c0_i32_0 = arith.constant 0 : i32
    return %arg0, %c0_i32 : i32, i32
  }
  func.func @transform_2(%arg0: i32) -> (i32, i32) {
    %c0_i32 = arith.constant 0 : i32
    %c0_i32_0 = arith.constant 0 : i32
    return %arg0, %c0_i32 : i32, i32
  }
}

</mosaic_0001>

<bundles_post_ra>
// kernel: tpu_custom_call.1
= control target key start
LH: loop header
LB: loop body
LE: loop exit
PB: predicated region body
PF: predicated region fallthrough
CT: control target
= control target key end

     0   :  { %7 = vsyncpa [#allocation3], 0  ;;  %s205_s0 = inlined_call_operand.hbm [shape: f32[32,128], index: 0, kind: input, shape index: {}]   ;;  %s206_s1 = inlined_call_operand.hbm [shape: f32[32,128], index: 1, kind: input, shape index: {}]   ;;  %s207_s2 = inlined_call_operand.hbm [shape: f32[32,128], index: 2, kind: output, shape index: {}]  }
   0x1   :  { %8 = vsyncpa [#allocation6], 0 }
   0x2   :  { %9 = vsyncpa [#allocation4], 0  ;;  %s14_s11 = sshll.u32 %s205_s0, 4  ;;  %s167_s12 = smov [#allocation2]   ;;  %s15_s11 = int_to_ptr.hbm [resolvable:$true] %s14_s11 }
   0x3   :  { %s16_s13 = sshll.u32 %s167_s12, 4  ;;  %s27_s16 = sshll.u32 %s206_s1, 4  ;;  %s17_s13 = int_to_ptr.vmem [resolvable:$true] %s16_s13  ;;  %s28_s16 = int_to_ptr.hbm [resolvable:$true] %s27_s16 }
   0x4   :  { %s168_s17 = smov 128   ;;  %s169_s18 = smov 8  }
   0x5   :  { %22 = dma.hbm_to_vmem [thread:$0]  %s15_s11, 512, %s17_s13, [#allocation3], %s168_s17, %s168_s17, %s169_s18  }
   0x6   :  { %s170_s19 = smov [#allocation5]  }
   0x7   :  { %s29_s20 = sshll.u32 %s170_s19, 4  ;;  %s30_s20 = int_to_ptr.vmem [resolvable:$true] %s29_s20 }
   0x8   :  { %35 = dma.hbm_to_vmem [thread:$0]  %s28_s16, 512, %s30_s20, [#allocation6], %s168_s17, %s168_s17, %s169_s18  }
   0x9   :  { %161 = dma.done.wait [#allocation3], 512  }
   0xa   :  { %162 = vsyncadd [#allocation3], 4294966784 }
   0xb   :  { %163 = dma.done.wait [#allocation6], 512  }
   0xc   :  { %164 = vsyncadd [#allocation6], 4294966784  ;;  %v44_v0 = vld [vmem:[#allocation2] sm:$0xff]  ;;  %v45_v2 = vld [vmem:[#allocation2 + $0x8] sm:$0xff]  ;;  %s171_s0 = smov [#allocation7]   ;;  %s70_s23 = sshll.u32 %s207_s2, 4  ;;  %s71_s23 = int_to_ptr.hbm [resolvable:$true] %s70_s23 }
   0xd   :  { %v48_v1 = vld [vmem:[#allocation5] sm:$0xff]  ;;  %v49_v4 = vld [vmem:[#allocation5 + $0x8] sm:$0xff]  ;;  %v46_v5 = vld [vmem:[#allocation2 + $0x10] sm:$0xff]  ;;  %s68_s1 = sshll.u32 %s171_s0, 4  ;;  %s69_s1 = int_to_ptr.vmem [resolvable:$true] %s68_s1 }
   0xe   :  { %v52_v3 = vsub.f32 %v44_v0, %v48_v1  ;;  %v50_v6 = vld [vmem:[#allocation5 + $0x10] sm:$0xff]  ;;  %v53_v7 = vsub.f32 %v45_v2, %v49_v4  ;;  %v47_v9 = vld [vmem:[#allocation2 + $0x18] sm:$0xff] }
   0xf   :  { %v54_v8 = vsub.f32 %v46_v5, %v50_v6  ;;  %v51_v10 = vld [vmem:[#allocation5 + $0x18] sm:$0xff] }
  0x10   :  { %v56_v11 = vceil.f32 %v52_v3  ;;  %v55_v12 = vsub.f32 %v47_v9, %v51_v10  ;;  %v57_v13 = vceil.f32 %v53_v7 }
  0x11   :  { %v58_v14 = vceil.f32 %v54_v8 }
  0x12   :  { %60 = vst [vmem:[#allocation7] sm:$0xff] %v56_v11  ;;  %v59_v15 = vceil.f32 %v55_v12 }
  0x13   :  { %61 = vst [vmem:[#allocation7 + $0x8] sm:$0xff] %v57_v13 }
  0x14   :  { %62 = vst [vmem:[#allocation7 + $0x10] sm:$0xff] %v58_v14 }
  0x15   :  { %63 = vst [vmem:[#allocation7 + $0x18] sm:$0xff] %v59_v15 }
  0x16   :  { %76 = dma.vmem_to_hbm [thread:$0]  %s69_s1, 512, %s71_s23, [#allocation4], %s168_s17, %s168_s17, %s169_s18  }
  0x17   :  { %165 = dma.done.wait [#allocation4], 512  }
  0x18   :  { %166 = vsyncadd [#allocation4], 4294966784 }
  0x19   :  { %81 = vsyncpa [#allocation3], 1 }
  0x1a   :  { %82 = vsyncpa [#allocation6], 1 }
  0x1b   :  { %83 = vsyncpa [#allocation4], 1 }

</bundles_post_ra>
